<compile_context>
chip_gen: v7x
topology: tpu7x:2x2x1
jax: 0.10.0
libtpu: 0.0.40
codegen_flags: <defaults>
</compile_context>

<pallas_src>
import jax
import jax.numpy as jnp
from jax.experimental import pallas as pl
from jax.experimental.pallas import tpu as pltpu

IN_DIM = 3072   # 3 * 32 * 32
H1_DIM = 100
H2_DIM = 25
OUT_DIM = 10
H1_PAD = 128    # lane-dense padded hidden width (fc1 out / fc12 in)
H2_PAD = 128    # lane-dense padded hidden width (fc12 out / fc2 in)
OUT_PAD = 128   # lane-dense output slab; real classes live in [:, :OUT_DIM]


def _mlp_kernel(x_ref, w1_ref, b1_ref, w2_ref, b2_ref, w3_ref, b3_ref, o_ref):
    # One batch tile per grid step; all three layers fused.
    # x arrives as f32 from HBM; cast to bf16 in VMEM (hidden under the DMA).
    x = x_ref[...].astype(jnp.bfloat16)                             # (TM, 3072)

    # fc1 + relu  (MXU bf16 inputs, f32 accumulate). Padded cols give relu(0)=0.
    h1 = jnp.dot(x, w1_ref[...], preferred_element_type=jnp.float32)
    h1 = jnp.maximum(h1 + b1_ref[...], 0.0)                         # (TM, 128) f32

    # fc12 + relu
    h2 = jnp.dot(h1.astype(jnp.bfloat16), w2_ref[...],
                 preferred_element_type=jnp.float32)
    h2 = jnp.maximum(h2 + b2_ref[...], 0.0)                         # (TM, 128) f32

    # fc2 + sigmoid (output padded to 128 lanes; pad lanes hold sigmoid(0)=0.5
    # and are sliced off in the wrapper).  exp and approx-reciprocal both
    # issue on the EUP slot.
    z3 = jnp.dot(h2.astype(jnp.bfloat16), w3_ref[...],
                 preferred_element_type=jnp.float32)
    z3 = z3 + b3_ref[...]                                           # (TM, 128) f32
    o_ref[...] = pl.reciprocal(1.0 + jnp.exp(-z3), approx=True).astype(o_ref.dtype)


def simple_nn_forward(x_nchw, params, *, tm_max=1024):
    """x_nchw: (B, 3, 32, 32) float32. Returns (B, 10) float32 probabilities."""
    B = x_nchw.shape[0]
    # Pure reshape (bitcast) — no dtype convert here; the kernel casts in VMEM.
    x_flat = x_nchw.reshape(B, IN_DIM)

    w1, b1, w2, b2, w3, b3 = params
    # Zero-pad all feature dims to lane-dense 128-wide slabs. Zeros propagate
    # as relu(0)=0 through the padded hidden lanes, so the math is unchanged.
    w1p = jnp.pad(w1.astype(jnp.bfloat16), ((0, 0), (0, H1_PAD - H1_DIM)))
    b1p = jnp.pad(b1.reshape(1, -1).astype(jnp.float32),
                  ((0, 0), (0, H1_PAD - H1_DIM)))
    w2p = jnp.pad(w2.astype(jnp.bfloat16),
                  ((0, H1_PAD - H1_DIM), (0, H2_PAD - H2_DIM)))
    b2p = jnp.pad(b2.reshape(1, -1).astype(jnp.float32),
                  ((0, 0), (0, H2_PAD - H2_DIM)))
    w3p = jnp.pad(w3.astype(jnp.bfloat16),
                  ((0, H2_PAD - H2_DIM), (0, OUT_PAD - OUT_DIM)))
    b3p = jnp.pad(b3.reshape(1, -1).astype(jnp.float32),
                  ((0, 0), (0, OUT_PAD - OUT_DIM)))

    # Batch tile: multiple of 8 sublanes, default 1024 rows. At TM=1024 with
    # f32 x the double-buffered tile is 2*12 MiB + 2*0.25 MiB out + ~0.9 MiB
    # weights ~= 26 MiB -> raise the scoped VMEM limit to 48 MiB (v5e default
    # scope is 16 MiB; v7x physical is 64 MiB so 48 MiB still fits).
    TM = tm_max if B >= tm_max else max(8, ((B + 7) // 8) * 8)
    B_pad = ((B + TM - 1) // TM) * TM
    if B_pad != B:
        # Only copies when B isn't already a multiple of TM.
        x_flat = jnp.pad(x_flat, ((0, B_pad - B), (0, 0)))
    grid = (B_pad // TM,)

    # Weights/biases: constant index_map -> VMEM resident; single-buffered
    # (nothing to pipeline), which frees VMEM and per-step bookkeeping.
    def w_spec(shape):
        return pl.BlockSpec(shape, lambda i: (0, 0), pipeline_mode=pl.Buffered(1))

    out = pl.pallas_call(
        _mlp_kernel,
        out_shape=jax.ShapeDtypeStruct((B_pad, OUT_PAD), jnp.bfloat16),
        grid=grid,
        in_specs=[
            pl.BlockSpec((TM, IN_DIM), lambda i: (i, 0)),   # x: tiled over batch
            w_spec((IN_DIM, H1_PAD)),                        # w1
            w_spec((1, H1_PAD)),                             # b1
            w_spec((H1_PAD, H2_PAD)),                        # w2
            w_spec((1, H2_PAD)),                             # b2
            w_spec((H2_PAD, OUT_PAD)),                       # w3
            w_spec((1, OUT_PAD)),                            # b3
        ],
        out_specs=pl.BlockSpec((TM, OUT_PAD), lambda i: (i, 0)),
        compiler_params=pltpu.CompilerParams(
            dimension_semantics=("parallel",),
            vmem_limit_bytes=48 << 20,
        ),
    )(x_flat, w1p, b1p, w2p, b2p, w3p, b3p)

    return out[:B, :OUT_DIM].astype(jnp.float32)


def init_params(key):
    """Deterministic init mimicking nn.Linear's U(-1/sqrt(fan_in), +1/sqrt(fan_in)).
    Weights are returned transposed to (in_features, out_features) and stored
    in bfloat16 (halves HBM weight traffic); biases stay float32."""
    dims = [(IN_DIM, H1_DIM), (H1_DIM, H2_DIM), (H2_DIM, OUT_DIM)]
    params = []
    for i, (fan_in, fan_out) in enumerate(dims):
        kw, kb = jax.random.split(jax.random.fold_in(key, i))
        bound = 1.0 / (fan_in ** 0.5)
        w = jax.random.uniform(kw, (fan_in, fan_out), jnp.float32, -bound, bound)
        b = jax.random.uniform(kb, (fan_out,), jnp.float32, -bound, bound)
        params += [w.astype(jnp.bfloat16), b]
    return tuple(params)


def _reference_forward(x_nchw, params):
    """Plain-JAX reference (f32 math on the same stored params)."""
    w1, b1, w2, b2, w3, b3 = params
    x = x_nchw.reshape(x_nchw.shape[0], -1).astype(jnp.float32)
    h1 = jnp.maximum(x @ w1.astype(jnp.float32) + b1, 0.0)
    h2 = jnp.maximum(h1 @ w2.astype(jnp.float32) + b2, 0.0)
    return jax.nn.sigmoid(h2 @ w3.astype(jnp.float32) + b3)


if __name__ == "__main__":
    key = jax.random.PRNGKey(0)
    k_x, k_p = jax.random.split(key)

    # CIFAR-10-shaped input at a small batch: (B=2, C=3, H=32, W=32) -> 3072 features.
    x = jax.random.normal(k_x, (2, 3, 32, 32), dtype=jnp.float32)
    params = init_params(k_p)

    out = jax.block_until_ready(simple_nn_forward(x, params))
    ref = jax.block_until_ready(_reference_forward(x, params))

    assert out.shape == (2, 10)
    # bf16 matmul inputs + bf16 output slab + approx-reciprocal sigmoid vs. f32 reference.
    assert jnp.allclose(out, ref, atol=2e-2, rtol=0.0), (out, ref)

    print("KERNEL_OK")
</pallas_src>

<mosaic_0001>
module attributes {stable_mosaic.version = 11 : i64} {
  func.func @_mlp_kernel(%arg0: i32, %arg1: memref<8x3072xf32, #tpu.memory_space<vmem>>, %arg2: memref<3072x128xbf16, #tpu.memory_space<vmem>>, %arg3: memref<1x128xf32, #tpu.memory_space<vmem>>, %arg4: memref<128x128xbf16, #tpu.memory_space<vmem>>, %arg5: memref<1x128xf32, #tpu.memory_space<vmem>>, %arg6: memref<128x128xbf16, #tpu.memory_space<vmem>>, %arg7: memref<1x128xf32, #tpu.memory_space<vmem>>, %arg8: memref<8x128xbf16, #tpu.memory_space<vmem>>) attributes {dimension_semantics = [#tpu.dimension_semantics<parallel>], iteration_bounds = array<i64: 1>, scalar_prefetch = 0 : i64, scratch_operands = 0 : i64, tpu.core_type = #tpu.core_type<tc>, window_params = [{transform_indices = @transform_0, window_bounds = array<i64: 8, 3072>}, {pipeline_mode = #tpu.pipeline_mode<synchronous>, transform_indices = @transform_1, window_bounds = array<i64: 3072, 128>}, {pipeline_mode = #tpu.pipeline_mode<synchronous>, transform_indices = @transform_2, window_bounds = array<i64: 1, 128>}, {pipeline_mode = #tpu.pipeline_mode<synchronous>, transform_indices = @transform_3, window_bounds = array<i64: 128, 128>}, {pipeline_mode = #tpu.pipeline_mode<synchronous>, transform_indices = @transform_4, window_bounds = array<i64: 1, 128>}, {pipeline_mode = #tpu.pipeline_mode<synchronous>, transform_indices = @transform_5, window_bounds = array<i64: 128, 128>}, {pipeline_mode = #tpu.pipeline_mode<synchronous>, transform_indices = @transform_6, window_bounds = array<i64: 1, 128>}, {transform_indices = @transform_7, window_bounds = array<i64: 8, 128>}]} {
    %c0 = arith.constant 0 : index
    %c0_0 = arith.constant 0 : index
    %0 = vector.load %arg1[%c0, %c0_0] : memref<8x3072xf32, #tpu.memory_space<vmem>>, vector<8x3072xf32>
    %1 = arith.truncf %0 : vector<8x3072xf32> to vector<8x3072xbf16>
    %c0_1 = arith.constant 0 : index
    %c0_2 = arith.constant 0 : index
    %2 = vector.load %arg2[%c0_1, %c0_2] : memref<3072x128xbf16, #tpu.memory_space<vmem>>, vector<3072x128xbf16>
    %cst = arith.constant dense<0.000000e+00> : vector<8x128xf32>
    %3 = tpu.matmul %1, %2, %cst {dimension_numbers = #tpu.dot_dimension_numbers<[1], [0], [0], [1], [0, 0, 1, 1], [], []>} : vector<8x3072xbf16>, vector<3072x128xbf16>, vector<8x128xf32> -> vector<8x128xf32>
    %c0_3 = arith.constant 0 : index
    %c0_4 = arith.constant 0 : index
    %4 = vector.load %arg3[%c0_3, %c0_4] : memref<1x128xf32, #tpu.memory_space<vmem>>, vector<1x128xf32>
    %5 = vector.broadcast %4 : vector<1x128xf32> to vector<8x128xf32>
    %6 = arith.addf %3, %5 : vector<8x128xf32>
    %cst_5 = arith.constant 0.000000e+00 : f32
    %7 = vector.broadcast %cst_5 : f32 to vector<8x128xf32>
    %8 = arith.maximumf %6, %7 : vector<8x128xf32>
    %9 = arith.truncf %8 : vector<8x128xf32> to vector<8x128xbf16>
    %c0_6 = arith.constant 0 : index
    %c0_7 = arith.constant 0 : index
    %10 = vector.load %arg4[%c0_6, %c0_7] : memref<128x128xbf16, #tpu.memory_space<vmem>>, vector<128x128xbf16>
    %cst_8 = arith.constant dense<0.000000e+00> : vector<8x128xf32>
    %11 = tpu.matmul %9, %10, %cst_8 {dimension_numbers = #tpu.dot_dimension_numbers<[1], [0], [0], [1], [0, 0, 1, 1], [], []>} : vector<8x128xbf16>, vector<128x128xbf16>, vector<8x128xf32> -> vector<8x128xf32>
    %c0_9 = arith.constant 0 : index
    %c0_10 = arith.constant 0 : index
    %12 = vector.load %arg5[%c0_9, %c0_10] : memref<1x128xf32, #tpu.memory_space<vmem>>, vector<1x128xf32>
    %13 = vector.broadcast %12 : vector<1x128xf32> to vector<8x128xf32>
    %14 = arith.addf %11, %13 : vector<8x128xf32>
    %cst_11 = arith.constant 0.000000e+00 : f32
    %15 = vector.broadcast %cst_11 : f32 to vector<8x128xf32>
    %16 = arith.maximumf %14, %15 : vector<8x128xf32>
    %17 = arith.truncf %16 : vector<8x128xf32> to vector<8x128xbf16>
    %c0_12 = arith.constant 0 : index
    %c0_13 = arith.constant 0 : index
    %18 = vector.load %arg6[%c0_12, %c0_13] : memref<128x128xbf16, #tpu.memory_space<vmem>>, vector<128x128xbf16>
    %cst_14 = arith.constant dense<0.000000e+00> : vector<8x128xf32>
    %19 = tpu.matmul %17, %18, %cst_14 {dimension_numbers = #tpu.dot_dimension_numbers<[1], [0], [0], [1], [0, 0, 1, 1], [], []>} : vector<8x128xbf16>, vector<128x128xbf16>, vector<8x128xf32> -> vector<8x128xf32>
    %c0_15 = arith.constant 0 : index
    %c0_16 = arith.constant 0 : index
    %20 = vector.load %arg7[%c0_15, %c0_16] : memref<1x128xf32, #tpu.memory_space<vmem>>, vector<1x128xf32>
    %21 = vector.broadcast %20 : vector<1x128xf32> to vector<8x128xf32>
    %22 = arith.addf %19, %21 : vector<8x128xf32>
    %cst_17 = arith.constant 0.000000e+00 : f32
    %23 = vector.broadcast %cst_17 : f32 to vector<8x128xf32>
    %24 = arith.subf %23, %22 : vector<8x128xf32>
    %25 = math.exp %24 : vector<8x128xf32>
    %cst_18 = arith.constant 1.000000e+00 : f32
    %26 = vector.broadcast %cst_18 : f32 to vector<8x128xf32>
    %27 = arith.addf %26, %25 : vector<8x128xf32>
    %28 = tpu.reciprocal %27 {approx = true} : vector<8x128xf32> -> vector<8x128xf32>
    %29 = arith.truncf %28 : vector<8x128xf32> to vector<8x128xbf16>
    %c0_19 = arith.constant 0 : index
    %c0_20 = arith.constant 0 : index
    %30 = vector.load %arg8[%c0_19, %c0_20] : memref<8x128xbf16, #tpu.memory_space<vmem>>, vector<8x128xbf16>
    tpu.vector_store %arg8[%c0_19, %c0_20], %29 {strides = array<i32>} : memref<8x128xbf16, #tpu.memory_space<vmem>>, vector<8x128xbf16>,
    return
  }
  func.func @transform_0(%arg0: i32) -> (i32, i32) {
    %c0_i32 = arith.constant 0 : i32
    %c0_i32_0 = arith.constant 0 : i32
    return %arg0, %c0_i32 : i32, i32
  }
  func.func @transform_1(%arg0: i32) -> (i32, i32) {
    %c0_i32 = arith.constant 0 : i32
    %c0_i32_0 = arith.constant 0 : i32
    %c0_i32_1 = arith.constant 0 : i32
    return %c0_i32, %c0_i32_0 : i32, i32
  }
  func.func @transform_2(%arg0: i32) -> (i32, i32) {
    %c0_i32 = arith.constant 0 : i32
    %c0_i32_0 = arith.constant 0 : i32
    %c0_i32_1 = arith.constant 0 : i32
    return %c0_i32, %c0_i32_0 : i32, i32
  }
  func.func @transform_3(%arg0: i32) -> (i32, i32) {
    %c0_i32 = arith.constant 0 : i32
    %c0_i32_0 = arith.constant 0 : i32
    %c0_i32_1 = arith.constant 0 : i32
    return %c0_i32, %c0_i32_0 : i32, i32
  }
  func.func @transform_4(%arg0: i32) -> (i32, i32) {
    %c0_i32 = arith.constant 0 : i32
    %c0_i32_0 = arith.constant 0 : i32
    %c0_i32_1 = arith.constant 0 : i32
    return %c0_i32, %c0_i32_0 : i32, i32
  }
  func.func @transform_5(%arg0: i32) -> (i32, i32) {
    %c0_i32 = arith.constant 0 : i32
    %c0_i32_0 = arith.constant 0 : i32
    %c0_i32_1 = arith.constant 0 : i32
    return %c0_i32, %c0_i32_0 : i32, i32
  }
  func.func @transform_6(%arg0: i32) -> (i32, i32) {
    %c0_i32 = arith.constant 0 : i32
    %c0_i32_0 = arith.constant 0 : i32
    %c0_i32_1 = arith.constant 0 : i32
    return %c0_i32, %c0_i32_0 : i32, i32
  }
  func.func @transform_7(%arg0: i32) -> (i32, i32) {
    %c0_i32 = arith.constant 0 : i32
    %c0_i32_0 = arith.constant 0 : i32
    return %arg0, %c0_i32 : i32, i32
  }
}

</mosaic_0001>

<bundles_post_ra>
// kernel: tpu_custom_call.1
= control target key start
LH: loop header
LB: loop body
LE: loop exit
PB: predicated region body
PF: predicated region fallthrough
CT: control target
= control target key end

     0   :  { %12 = vsyncpa [#allocation3], 0  ;;  %s3419_s0 = inlined_call_operand.hbm [shape: f32[8,3072], index: 0, kind: input, shape index: {}]   ;;  %s3420_s1 = inlined_call_operand.hbm [shape: bf16[3072,128], index: 1, kind: input, shape index: {}]   ;;  %s3421_s2 = inlined_call_operand.vmem [shape: f32[1,128], index: 2, kind: input, shape index: {}]   ;;  %s3422_s3 = inlined_call_operand.hbm [shape: bf16[128,128], index: 3, kind: input, shape index: {}]   ;;  %s3423_s4 = inlined_call_operand.vmem [shape: f32[1,128], index: 4, kind: input, shape index: {}]   ;;  %s3424_s5 = inlined_call_operand.hbm [shape: bf16[128,128], index: 5, kind: input, shape index: {}]   ;;  %s3425_s6 = inlined_call_operand.vmem [shape: f32[1,128], index: 6, kind: input, shape index: {}]   ;;  %s3426_s7 = inlined_call_operand.hbm [shape: bf16[8,128], index: 7, kind: output, shape index: {}]  }
   0x1   :  { %13 = vsyncpa [#allocation6], 0 }
   0x2   :  { %14 = vsyncpa [#allocation9], 0 }
   0x3   :  { %15 = vsyncpa [#allocation4], 0  ;;  %s3274_s24 = smov [#allocation5]   ;;  %s3156_s28 = scalar_lea.hbm %s3420_s1, 24576 }
   0x4   :  { %s31_s25 = sshll.u32 %s3274_s24, 4  ;;  %p3157_p0 = scmp.ne.s32.totalorder %s3420_s1, %s3156_s28  ;;  %s32_s25 = int_to_ptr.vmem [resolvable:$true] %s31_s25 }
   0x5   :  { %p3160_p1 = scmp.lt.u32.totalorder %s3156_s28, %s3420_s1 }
   0x7   :  { %p3162_p2 = pnand %p3160_p1, %p3157_p0 }
   0x9   :  { %3165 = shalt.err (!%p3162_p2)
}
   0xa   :  { %s3166_s10 = scalar_lea.vmem %s32_s25, 24576  ;;  %p3171_p4 = scmp.lt.s32.totalorder %s32_s25, %s32_s25 }
   0xb   :  { %p3167_p3 = scmp.ne.s32.totalorder %s32_s25, %s3166_s10  ;;  %p3172_p5 = scmp.lt.s32.totalorder %s3166_s10, %s3166_s10 }
   0xd   :  { %p3173_p6 = por %p3172_p5, %p3171_p4 }
   0xf   :  { %p3174_p7 = pnand %p3173_p6, %p3167_p3 }
  0x11   :  { %3177 = shalt.err (!%p3174_p7)
}
  0x12   :  { %s3275_s11 = smov 64   ;;  %s3276_s12 = smov 4  }
  0x13   :  { %37 = dma.hbm_to_vmem [thread:$0]  %s3420_s1, 24576, %s32_s25, [#allocation6], %s3275_s11, %s3275_s11, %s3276_s12  }
  0x14   :  { %s3277_s15 = smov [#allocation2]   ;;  %s3278_s17 = smov [#allocation7]  }
  0x15   :  { %s22_s16 = sshll.u32 %s3277_s15, 4  ;;  %s45_s18 = sshll.u32 %s3278_s17, 4  ;;  %s23_s16 = int_to_ptr.vmem [resolvable:$true] %s22_s16  ;;  %s46_s18 = int_to_ptr.vmem [resolvable:$true] %s45_s18 }
  0x16   :  { %s3178_s21 = scalar_lea.hbm %s3419_s0, 3072 }
  0x17   :  { %p3179_p8 = scmp.ne.s32.totalorder %s3419_s0, %s3178_s21  ;;  %p3182_p9 = scmp.lt.u32.totalorder %s3178_s21, %s3419_s0 }
  0x19   :  { %p3184_p10 = pnand %p3182_p9, %p3179_p8 }
  0x1b   :  { %3187 = shalt.err (!%p3184_p10)
}
  0x1c   :  { %s3188_s1 = scalar_lea.vmem %s23_s16, 3072  ;;  %p3193_p12 = scmp.lt.s32.totalorder %s23_s16, %s23_s16 }
  0x1d   :  { %p3189_p11 = scmp.ne.s32.totalorder %s23_s16, %s3188_s1  ;;  %p3194_p13 = scmp.lt.s32.totalorder %s3188_s1, %s3188_s1 }
  0x1f   :  { %p3195_p0 = por %p3194_p13, %p3193_p12 }
  0x21   :  { %p3196_p1 = pnand %p3195_p0, %p3189_p11 }
  0x23   :  { %3199 = shalt.err (!%p3196_p1)
}
  0x24   :  { %25 = dma.hbm_to_vmem [thread:$0]  %s3419_s0, 3072, %s23_s16, [#allocation3]  }
  0x25   :  { %s3200_s30 = scalar_lea.hbm %s3422_s3, 1024 }
  0x26   :  { %p3201_p2 = scmp.ne.s32.totalorder %s3422_s3, %s3200_s30  ;;  %p3204_p3 = scmp.lt.u32.totalorder %s3200_s30, %s3422_s3 }
  0x28   :  { %p3206_p4 = pnand %p3204_p3, %p3201_p2 }
  0x2a   :  { %3209 = shalt.err (!%p3206_p4)
}
  0x2b   :  { %s3210_s14 = scalar_lea.vmem %s46_s18, 1024  ;;  %p3215_p6 = scmp.lt.s32.totalorder %s46_s18, %s46_s18 }
  0x2c   :  { %p3211_p5 = scmp.ne.s32.totalorder %s46_s18, %s3210_s14  ;;  %p3216_p7 = scmp.lt.s32.totalorder %s3210_s14, %s3210_s14 }
  0x2e   :  { %p3217_p8 = por %p3216_p7, %p3215_p6 }
  0x30   :  { %p3218_p9 = pnand %p3217_p8, %p3211_p5 }
  0x32   :  { %3221 = shalt.err (!%p3218_p9)
}
  0x33   :  { %51 = dma.hbm_to_vmem [thread:$0]  %s3422_s3, 1024, %s46_s18, [#allocation6], %s3275_s11, %s3275_s11, %s3276_s12  }
  0x34   :  { %s3279_s16 = smov [#allocation8]   ;;  %s3222_s21 = scalar_lea.hbm %s3424_s5, 1024 }
  0x35   :  { %s59_s17 = sshll.u32 %s3279_s16, 4  ;;  %p3223_p10 = scmp.ne.s32.totalorder %s3424_s5, %s3222_s21  ;;  %s60_s17 = int_to_ptr.vmem [resolvable:$true] %s59_s17 }
  0x36   :  { %p3226_p11 = scmp.lt.u32.totalorder %s3222_s21, %s3424_s5 }
  0x38   :  { %p3228_p12 = pnand %p3226_p11, %p3223_p10 }
  0x3a   :  { %3231 = shalt.err (!%p3228_p12)
}
  0x3b   :  { %s3232_s1 = scalar_lea.vmem %s60_s17, 1024  ;;  %p3237_p0 = scmp.lt.s32.totalorder %s60_s17, %s60_s17 }
  0x3c   :  { %p3233_p13 = scmp.ne.s32.totalorder %s60_s17, %s3232_s1  ;;  %p3238_p1 = scmp.lt.s32.totalorder %s3232_s1, %s3232_s1 }
  0x3e   :  { %p3239_p2 = por %p3238_p1, %p3237_p0 }
  0x40   :  { %p3240_p3 = pnand %p3239_p2, %p3233_p13 }
  0x42   :  { %3243 = shalt.err (!%p3240_p3)
}
  0x43   :  { %65 = dma.hbm_to_vmem [thread:$0]  %s3424_s5, 1024, %s60_s17, [#allocation9], %s3275_s11, %s3275_s11, %s3276_s12  }
  0x44   :  { %3266 = dma.done.wait [#allocation3], 3072  }
  0x45   :  { %3267 = vsyncadd [#allocation3], 4294964224 }
  0x46   :  { %3268 = dma.done.wait [#allocation6], 25600  }
  0x47   :  { %3269 = vsyncadd [#allocation6], 4294941696 }
  0x48   :  { %3270 = dma.done.wait [#allocation9], 1024  }
  0x49   :  { %3271 = vsyncadd [#allocation9], 4294966272  ;;  %v2944_v0 = vld [vmem:[#allocation5 + $0x40] sm:$0xff]   ;;  %v2948_v4 = vld [vmem:[#allocation5 + $0x48] sm:$0xff]   ;;  %vm3281_vm0 = vmmov 0  }
  0x4a   :  { %v2945_v1 = vld [vmem:[#allocation5 + $0xc0] sm:$0xff]   ;;  %2613 = vmatprep.subr.bf16.mxu0 %v2944_v0  ;;  %v2949_v5 = vld [vmem:[#allocation5 + $0xc8] sm:$0xff]   ;;  %v2952_v8 = vld [vmem:[#allocation5 + $0x50] sm:$0xff]  }
  0x4b   :  { %v2946_v2 = vld [vmem:[#allocation5] sm:$0xff]   ;;  %2635 = vmatprep.subr.bf16.mxu1 %v2945_v1  ;;  %v2950_v6 = vld [vmem:[#allocation5 + $0x8] sm:$0xff]   ;;  %v2953_v9 = vld [vmem:[#allocation5 + $0xd0] sm:$0xff]  }
  0x4c   :  { %v2947_v3 = vld [vmem:[#allocation5 + $0x80] sm:$0xff]   ;;  %2614 = vmatpush3.bf16.msra.mxu0 %v2946_v2  ;;  %v2951_v7 = vld [vmem:[#allocation5 + $0x88] sm:$0xff]   ;;  %v2954_v10 = vld [vmem:[#allocation5 + $0x10] sm:$0xff]  }
  0x4d   :  { %2636 = vmatpush3.bf16.msra.mxu1 %v2947_v3  ;;  %2615 = vmatprep.subr.bf16.mxu0 %v2948_v4  ;;  %v2955_v11 = vld [vmem:[#allocation5 + $0x90] sm:$0xff]   ;;  %v2956_v12 = vld [vmem:[#allocation5 + $0x58] sm:$0xff]   ;;  %v2960_v16 = vld [vmem:[#allocation5 + $0x60] sm:$0xff]  }
  0x4e   :  { %2637 = vmatprep.subr.bf16.mxu1 %v2949_v5  ;;  %v2957_v13 = vld [vmem:[#allocation5 + $0xd8] sm:$0xff]   ;;  %v2961_v17 = vld [vmem:[#allocation5 + $0xe0] sm:$0xff]   ;;  %v2964_v20 = vld [vmem:[#allocation5 + $0x68] sm:$0xff]  }
  0x4f   :  { %v2958_v14 = vld [vmem:[#allocation5 + $0x18] sm:$0xff]   ;;  %v2962_v18 = vld [vmem:[#allocation5 + $0x20] sm:$0xff]   ;;  %v2965_v21 = vld [vmem:[#allocation5 + $0xe8] sm:$0xff]  }
  0x50   :  { %2616 = vmatpush3.bf16.msra.mxu0 %v2950_v6  ;;  %v2959_v15 = vld [vmem:[#allocation5 + $0x98] sm:$0xff]   ;;  %v2963_v19 = vld [vmem:[#allocation5 + $0xa0] sm:$0xff]   ;;  %v2966_v22 = vld [vmem:[#allocation5 + $0x28] sm:$0xff]  }
  0x51   :  { %2638 = vmatpush3.bf16.msra.mxu1 %v2951_v7  ;;  %2617 = vmatprep.subr.bf16.mxu0 %v2952_v8  ;;  %v2967_v23 = vld [vmem:[#allocation5 + $0xa8] sm:$0xff]   ;;  %v2968_v24 = vld [vmem:[#allocation5 + $0x70] sm:$0xff]   ;;  %v2972_v28 = vld [vmem:[#allocation5 + $0x78] sm:$0xff]  }
  0x52   :  { %2639 = vmatprep.subr.bf16.mxu1 %v2953_v9  ;;  %v2969_v25 = vld [vmem:[#allocation5 + $0xf0] sm:$0xff]   ;;  %v2973_v29 = vld [vmem:[#allocation5 + $0xf8] sm:$0xff]   ;;  %v82_v32 = vld [vmem:[#allocation2 + $0x8] sm:$0xff] }
  0x53   :  { %v2970_v26 = vld [vmem:[#allocation5 + $0x30] sm:$0xff]   ;;  %v2974_v30 = vld [vmem:[#allocation5 + $0x38] sm:$0xff]   ;;  %v81_v34 = vld [vmem:[#allocation2] sm:$0xff]  ;;  %v106_v35 = vpack.c.bf16 %v82_v32, %v82_v32 }
  0x54   :  { %2618 = vmatpush3.bf16.msra.mxu0 %v2954_v10  ;;  %v2971_v27 = vld [vmem:[#allocation5 + $0xb0] sm:$0xff]   ;;  %v2975_v31 = vld [vmem:[#allocation5 + $0xb8] sm:$0xff]   ;;  %v105_v37 = vpack.c.bf16 %v81_v34, %v81_v34  ;;  %v2976_v40 = vld [vmem:[#allocation5 + $0x140] sm:$0xff]  }
  0x55   :  { %2640 = vmatpush3.bf16.msra.mxu1 %v2955_v11  ;;  %2619 = vmatprep.subr.bf16.mxu0 %v2956_v12  ;;  %v84_v33 = vld [vmem:[#allocation2 + $0x18] sm:$0xff]  ;;  %v83_v38 = vld [vmem:[#allocation2 + $0x10] sm:$0xff]  ;;  %v2977_v41 = vld [vmem:[#allocation5 + $0x1c0] sm:$0xff]  }
  0x56   :  { %2641 = vmatprep.subr.bf16.mxu1 %v2957_v13  ;;  %v108_v36 = vpack.c.bf16 %v84_v33, %v84_v33  ;;  %v107_v39 = vpack.c.bf16 %v83_v38, %v83_v38  ;;  %1704 = vmatprep.mubr.bf16.mxu0 %v106_v35  ;;  %v2978_v42 = vld [vmem:[#allocation5 + $0x100] sm:$0xff]   ;;  %v2980_v44 = vld [vmem:[#allocation5 + $0x148] sm:$0xff]   ;;  %v2984_v48 = vld [vmem:[#allocation5 + $0x150] sm:$0xff]  }
  0x57   :  { %v2979_v43 = vld [vmem:[#allocation5 + $0x180] sm:$0xff]   ;;  %v2981_v45 = vld [vmem:[#allocation5 + $0x1c8] sm:$0xff]   ;;  %v2985_v49 = vld [vmem:[#allocation5 + $0x1d0] sm:$0xff]  }
  0x58   :  { %2620 = vmatpush3.bf16.msra.mxu0 %v2958_v14  ;;  %1744 = vmatprep.mubr.bf16.mxu1 %v108_v36  ;;  %v2982_v46 = vld [vmem:[#allocation5 + $0x108] sm:$0xff]   ;;  %v2986_v50 = vld [vmem:[#allocation5 + $0x110] sm:$0xff]   ;;  %v2988_v52 = vld [vmem:[#allocation5 + $0x158] sm:$0xff]  }
  0x59   :  { %2642 = vmatpush3.bf16.msra.mxu1 %v2959_v15  ;;  %2621 = vmatprep.subr.bf16.mxu0 %v2960_v16  ;;  %v2983_v47 = vld [vmem:[#allocation5 + $0x188] sm:$0xff]   ;;  %v2987_v51 = vld [vmem:[#allocation5 + $0x190] sm:$0xff]   ;;  %v2989_v53 = vld [vmem:[#allocation5 + $0x1d8] sm:$0xff]  }
  0x5a   :  { %2643 = vmatprep.subr.bf16.mxu1 %v2961_v17  ;;  %v2990_v54 = vld [vmem:[#allocation5 + $0x118] sm:$0xff]   ;;  %v2992_v56 = vld [vmem:[#allocation5 + $0x160] sm:$0xff]   ;;  %v2996_v60 = vld [vmem:[#allocation5 + $0x168] sm:$0xff]  }
  0x5b   :  { %v2991_v55 = vld [vmem:[#allocation5 + $0x198] sm:$0xff]   ;;  %v2993_v57 = vld [vmem:[#allocation5 + $0x1e0] sm:$0xff]   ;;  %v2997_v61 = vld [vmem:[#allocation5 + $0x1e8] sm:$0xff]  }
  0x5c   :  { %2622 = vmatpush3.bf16.msra.mxu0 %v2962_v18  ;;  %v2994_v58 = vld [vmem:[#allocation5 + $0x120] sm:$0xff]   ;;  %v2998_v62 = vld [vmem:[#allocation5 + $0x128] sm:$0xff]   ;;  %v3000_v0 = vld [vmem:[#allocation5 + $0x170] sm:$0xff]  }
  0x5d   :  { %2644 = vmatpush3.bf16.msra.mxu1 %v2963_v19  ;;  %2623 = vmatprep.subr.bf16.mxu0 %v2964_v20  ;;  %v2995_v59 = vld [vmem:[#allocation5 + $0x1a0] sm:$0xff]   ;;  %v2999_v63 = vld [vmem:[#allocation5 + $0x1a8] sm:$0xff]   ;;  %v3001_v1 = vld [vmem:[#allocation5 + $0x1f0] sm:$0xff]  }
  0x5e   :  { %2645 = vmatprep.subr.bf16.mxu1 %v2965_v21  ;;  %v3002_v2 = vld [vmem:[#allocation5 + $0x130] sm:$0xff]   ;;  %v3004_v4 = vld [vmem:[#allocation5 + $0x178] sm:$0xff]   ;;  %v86_v8 = vld [vmem:[#allocation2 + $0x28] sm:$0xff] }
  0x5f   :  { %v3003_v3 = vld [vmem:[#allocation5 + $0x1b0] sm:$0xff]   ;;  %v3005_v5 = vld [vmem:[#allocation5 + $0x1f8] sm:$0xff]   ;;  %v110_v10 = vpack.c.bf16 %v86_v8, %v86_v8  ;;  %v85_v12 = vld [vmem:[#allocation2 + $0x20] sm:$0xff] }
  0x60   :  { %2624 = vmatpush3.bf16.msra.mxu0 %v2966_v22  ;;  %v3006_v6 = vld [vmem:[#allocation5 + $0x138] sm:$0xff]   ;;  %v87_v13 = vld [vmem:[#allocation2 + $0x30] sm:$0xff]  ;;  %v109_v14 = vpack.c.bf16 %v85_v12, %v85_v12  ;;  %v3008_v16 = vld [vmem:[#allocation5 + $0x240] sm:$0xff]  }
  0x61   :  { %2646 = vmatpush3.bf16.msra.mxu1 %v2967_v23  ;;  %2625 = vmatprep.subr.bf16.mxu0 %v2968_v24  ;;  %v3007_v7 = vld [vmem:[#allocation5 + $0x1b8] sm:$0xff]   ;;  %v111_v15 = vpack.c.bf16 %v87_v13, %v87_v13  ;;  %v3009_v17 = vld [vmem:[#allocation5 + $0x2c0] sm:$0xff]   ;;  %v3012_v20 = vld [vmem:[#allocation5 + $0x248] sm:$0xff]  }
  0x62   :  { %2647 = vmatprep.subr.bf16.mxu1 %v2969_v25  ;;  %v88_v9 = vld [vmem:[#allocation2 + $0x38] sm:$0xff]  ;;  %v3010_v18 = vld [vmem:[#allocation5 + $0x200] sm:$0xff]   ;;  %v3013_v21 = vld [vmem:[#allocation5 + $0x2c8] sm:$0xff]  }
  0x63   :  { %v112_v11 = vpack.c.bf16 %v88_v9, %v88_v9  ;;  %v3011_v19 = vld [vmem:[#allocation5 + $0x280] sm:$0xff]   ;;  %v3014_v22 = vld [vmem:[#allocation5 + $0x208] sm:$0xff]   ;;  %v3016_v24 = vld [vmem:[#allocation5 + $0x250] sm:$0xff]  }
  0x64   :  { %2626 = vmatpush3.bf16.msra.mxu0 %v2970_v26  ;;  %v3015_v23 = vld [vmem:[#allocation5 + $0x288] sm:$0xff]   ;;  %v3017_v25 = vld [vmem:[#allocation5 + $0x2d0] sm:$0xff]   ;;  %v3024_v32 = vld [vmem:[#allocation5 + $0x260] sm:$0xff]  }
  0x65   :  { %2648 = vmatpush3.bf16.msra.mxu1 %v2971_v27  ;;  %2627 = vmatprep.subr.bf16.mxu0 %v2972_v28  ;;  %v3018_v26 = vld [vmem:[#allocation5 + $0x210] sm:$0xff]   ;;  %v3020_v28 = vld [vmem:[#allocation5 + $0x258] sm:$0xff]   ;;  %v3025_v33 = vld [vmem:[#allocation5 + $0x2e0] sm:$0xff]  }
  0x66   :  { %2649 = vmatprep.subr.bf16.mxu1 %v2973_v29  ;;  %v3019_v27 = vld [vmem:[#allocation5 + $0x290] sm:$0xff]   ;;  %v3021_v29 = vld [vmem:[#allocation5 + $0x2d8] sm:$0xff]   ;;  %v3026_v34 = vld [vmem:[#allocation5 + $0x220] sm:$0xff]  }
  0x67   :  { %v3027_v35 = vld [vmem:[#allocation5 + $0x2a0] sm:$0xff]   ;;  %v3028_v36 = vld [vmem:[#allocation5 + $0x268] sm:$0xff]  }
  0x68   :  { %2628 = vmatpush3.bf16.msra.mxu0 %v2974_v30  ;;  %v3022_v30 = vld [vmem:[#allocation5 + $0x218] sm:$0xff]   ;;  %v3030_v38 = vld [vmem:[#allocation5 + $0x228] sm:$0xff]   ;;  %v3056_v8 = vld [vmem:[#allocation5 + $0x360] sm:$0xff]  }
  0x69   :  { %2650 = vmatpush3.bf16.msra.mxu1 %v2975_v31  ;;  %2657 = vmatprep.subr.bf16.mxu0 %v2976_v40  ;;  %v3023_v31 = vld [vmem:[#allocation5 + $0x298] sm:$0xff]   ;;  %v3032_v40 = vld [vmem:[#allocation5 + $0x270] sm:$0xff]   ;;  %v3057_v9 = vld [vmem:[#allocation5 + $0x3e0] sm:$0xff]  }
  0x6a   :  { %2679 = vmatprep.subr.bf16.mxu1 %v2977_v41  ;;  %v3033_v41 = vld [vmem:[#allocation5 + $0x2f0] sm:$0xff]   ;;  %v3060_v12 = vld [vmem:[#allocation5 + $0x368] sm:$0xff]  }
  0x6b   :  { %1705 = vmatmul.mubr.bf16.vlgmr.msra.gmra.mrb[0].mxu0 %v105_v37  ;;  %v3029_v37 = vld [vmem:[#allocation5 + $0x2e8] sm:$0xff]  }
  0x6c   :  { %1745 = vmatmul.mubr.bf16.vlgmr.msra.gmra.mrb[0].mxu1 %v107_v39  ;;  %2658 = vmatpush3.bf16.msra.mxu0 %v2978_v42  ;;  %v3031_v39 = vld [vmem:[#allocation5 + $0x2a8] sm:$0xff]   ;;  %v3034_v42 = vld [vmem:[#allocation5 + $0x230] sm:$0xff]  }
  0x6d   :  { %2680 = vmatpush3.bf16.msra.mxu1 %v2979_v43  ;;  %2659 = vmatprep.subr.bf16.mxu0 %v2980_v44  ;;  %v3035_v43 = vld [vmem:[#allocation5 + $0x2b0] sm:$0xff]   ;;  %v3036_v44 = vld [vmem:[#allocation5 + $0x278] sm:$0xff]   ;;  %v3061_v13 = vld [vmem:[#allocation5 + $0x3e8] sm:$0xff]  }
  0x6e   :  { %2681 = vmatprep.subr.bf16.mxu1 %v2981_v45  ;;  %1784 = vmatprep.mubr.bf16.mxu0 %v110_v10  ;;  %v3037_v45 = vld [vmem:[#allocation5 + $0x2f8] sm:$0xff]   ;;  %v3058_v10 = vld [vmem:[#allocation5 + $0x320] sm:$0xff]  }
  0x6f   :  { %1824 = vmatprep.mubr.bf16.mxu1 %v112_v11  ;;  %v3059_v11 = vld [vmem:[#allocation5 + $0x3a0] sm:$0xff]  }
  0x70   :  { %2660 = vmatpush3.bf16.msra.mxu0 %v2982_v46  ;;  %v3038_v46 = vld [vmem:[#allocation5 + $0x238] sm:$0xff]  }
  0x71   :  { %2682 = vmatpush3.bf16.msra.mxu1 %v2983_v47  ;;  %2661 = vmatprep.subr.bf16.mxu0 %v2984_v48  ;;  %v3039_v47 = vld [vmem:[#allocation5 + $0x2b8] sm:$0xff]   ;;  %v90_v48 = vld [vmem:[#allocation2 + $0x48] sm:$0xff] }
  0x72   :  { %2683 = vmatprep.subr.bf16.mxu1 %v2985_v49  ;;  %v114_v49 = vpack.c.bf16 %v90_v48, %v90_v48  ;;  %v3088_v48 = vld [vmem:[#allocation5 + $0x460] sm:$0xff]  }
  0x74   :  { %2662 = vmatpush3.bf16.msra.mxu0 %v2986_v50  ;;  %v92_v50 = vld [vmem:[#allocation2 + $0x58] sm:$0xff] }
  0x75   :  { %2684 = vmatpush3.bf16.msra.mxu1 %v2987_v51  ;;  %2663 = vmatprep.subr.bf16.mxu0 %v2988_v52  ;;  %v89_v51 = vld [vmem:[#allocation2 + $0x40] sm:$0xff]  ;;  %v91_v52 = vld [vmem:[#allocation2 + $0x50] sm:$0xff] }
  0x76   :  { %2685 = vmatprep.subr.bf16.mxu1 %v2989_v53  ;;  %v116_v53 = vpack.c.bf16 %v92_v50, %v92_v50  ;;  %v3090_v50 = vld [vmem:[#allocation5 + $0x420] sm:$0xff]  }
  0x78   :  { %2664 = vmatpush3.bf16.msra.mxu0 %v2990_v54  ;;  %v113_v54 = vpack.c.bf16 %v89_v51, %v89_v51  ;;  %v3091_v51 = vld [vmem:[#allocation5 + $0x4a0] sm:$0xff]  }
  0x79   :  { %2686 = vmatpush3.bf16.msra.mxu1 %v2991_v55  ;;  %2665 = vmatprep.subr.bf16.mxu0 %v2992_v56  ;;  %v115_v55 = vpack.c.bf16 %v91_v52, %v91_v52  ;;  %v3040_v56 = vld [vmem:[#allocation5 + $0x340] sm:$0xff]   ;;  %v3092_v52 = vld [vmem:[#allocation5 + $0x468] sm:$0xff]  }
  0x7a   :  { %2687 = vmatprep.subr.bf16.mxu1 %v2993_v57  ;;  %v3041_v57 = vld [vmem:[#allocation5 + $0x3c0] sm:$0xff]  }
  0x7c   :  { %2666 = vmatpush3.bf16.msra.mxu0 %v2994_v58  ;;  %v3042_v58 = vld [vmem:[#allocation5 + $0x300] sm:$0xff]  }
  0x7d   :  { %2688 = vmatpush3.bf16.msra.mxu1 %v2995_v59  ;;  %2667 = vmatprep.subr.bf16.mxu0 %v2996_v60  ;;  %v3043_v59 = vld [vmem:[#allocation5 + $0x380] sm:$0xff]   ;;  %v3044_v60 = vld [vmem:[#allocation5 + $0x348] sm:$0xff]  }
  0x7e   :  { %2689 = vmatprep.subr.bf16.mxu1 %v2997_v61  ;;  %v3045_v61 = vld [vmem:[#allocation5 + $0x3c8] sm:$0xff]  }
  0x80   :  { %2668 = vmatpush3.bf16.msra.mxu0 %v2998_v62  ;;  %v3046_v62 = vld [vmem:[#allocation5 + $0x308] sm:$0xff]  }
  0x81   :  { %2690 = vmatpush3.bf16.msra.mxu1 %v2999_v63  ;;  %2669 = vmatprep.subr.bf16.mxu0 %v3000_v0  ;;  %v3047_v63 = vld [vmem:[#allocation5 + $0x388] sm:$0xff]   ;;  %v3048_v0 = vld [vmem:[#allocation5 + $0x350] sm:$0xff]  }
  0x82   :  { %2691 = vmatprep.subr.bf16.mxu1 %v3001_v1  ;;  %v3049_v1 = vld [vmem:[#allocation5 + $0x3d0] sm:$0xff]  }
  0x84   :  { %2670 = vmatpush3.bf16.msra.mxu0 %v3002_v2  ;;  %v3050_v2 = vld [vmem:[#allocation5 + $0x310] sm:$0xff]  }
  0x85   :  { %2692 = vmatpush3.bf16.msra.mxu1 %v3003_v3  ;;  %2671 = vmatprep.subr.bf16.mxu0 %v3004_v4  ;;  %v3051_v3 = vld [vmem:[#allocation5 + $0x390] sm:$0xff]   ;;  %v3052_v4 = vld [vmem:[#allocation5 + $0x358] sm:$0xff]  }
  0x86   :  { %2693 = vmatprep.subr.bf16.mxu1 %v3005_v5  ;;  %v3053_v5 = vld [vmem:[#allocation5 + $0x3d8] sm:$0xff]  }
  0x88   :  { %2672 = vmatpush3.bf16.msra.mxu0 %v3006_v6  ;;  %v3054_v6 = vld [vmem:[#allocation5 + $0x318] sm:$0xff]  }
  0x89   :  { %2694 = vmatpush3.bf16.msra.mxu1 %v3007_v7  ;;  %2701 = vmatprep.subr.bf16.mxu0 %v3008_v16  ;;  %v3055_v7 = vld [vmem:[#allocation5 + $0x398] sm:$0xff]   ;;  %v3064_v16 = vld [vmem:[#allocation5 + $0x370] sm:$0xff]  }
  0x8a   :  { %2723 = vmatprep.subr.bf16.mxu1 %v3009_v17  ;;  %v3065_v17 = vld [vmem:[#allocation5 + $0x3f0] sm:$0xff]  }
  0x8b   :  { %1785 = vmatmul.mubr.bf16.vlgmr.msra.gmra.mrb[4].mxu0 %v109_v14  ;;  %v3062_v14 = vld [vmem:[#allocation5 + $0x328] sm:$0xff]  }
  0x8c   :  { %1825 = vmatmul.mubr.bf16.vlgmr.msra.gmra.mrb[4].mxu1 %v111_v15  ;;  %2702 = vmatpush3.bf16.msra.mxu0 %v3010_v18  ;;  %v3063_v15 = vld [vmem:[#allocation5 + $0x3a8] sm:$0xff]   ;;  %v3066_v18 = vld [vmem:[#allocation5 + $0x330] sm:$0xff]  }
  0x8d   :  { %2724 = vmatpush3.bf16.msra.mxu1 %v3011_v19  ;;  %2703 = vmatprep.subr.bf16.mxu0 %v3012_v20  ;;  %v3067_v19 = vld [vmem:[#allocation5 + $0x3b0] sm:$0xff]   ;;  %v3068_v20 = vld [vmem:[#allocation5 + $0x378] sm:$0xff]  }
  0x8e   :  { %2725 = vmatprep.subr.bf16.mxu1 %v3013_v21  ;;  %1864 = vmatprep.mubr.bf16.mxu0 %v114_v49  ;;  %v3069_v21 = vld [vmem:[#allocation5 + $0x3f8] sm:$0xff]   ;;  %v3089_v49 = vld [vmem:[#allocation5 + $0x4e0] sm:$0xff]  }
  0x8f   :  { %1904 = vmatprep.mubr.bf16.mxu1 %v116_v53  ;;  %v3093_v53 = vld [vmem:[#allocation5 + $0x4e8] sm:$0xff]  }
  0x90   :  { %2704 = vmatpush3.bf16.msra.mxu0 %v3014_v22  ;;  %v3070_v22 = vld [vmem:[#allocation5 + $0x338] sm:$0xff]  }
  0x91   :  { %2726 = vmatpush3.bf16.msra.mxu1 %v3015_v23  ;;  %2705 = vmatprep.subr.bf16.mxu0 %v3016_v24  ;;  %v3071_v23 = vld [vmem:[#allocation5 + $0x3b8] sm:$0xff]   ;;  %v94_v24 = vld [vmem:[#allocation2 + $0x68] sm:$0xff] }
  0x92   :  { %2727 = vmatprep.subr.bf16.mxu1 %v3017_v25  ;;  %v96_v25 = vld [vmem:[#allocation2 + $0x78] sm:$0xff] }
  0x94   :  { %2706 = vmatpush3.bf16.msra.mxu0 %v3018_v26  ;;  %v93_v26 = vld [vmem:[#allocation2 + $0x60] sm:$0xff] }
  0x95   :  { %2728 = vmatpush3.bf16.msra.mxu1 %v3019_v27  ;;  %2707 = vmatprep.subr.bf16.mxu0 %v3020_v28  ;;  %v118_v27 = vpack.c.bf16 %v94_v24, %v94_v24  ;;  %v120_v28 = vpack.c.bf16 %v96_v25, %v96_v25  ;;  %v3120_v24 = vld [vmem:[#allocation5 + $0x560] sm:$0xff]  }
  0x96   :  { %2729 = vmatprep.subr.bf16.mxu1 %v3021_v29  ;;  %v117_v29 = vpack.c.bf16 %v93_v26, %v93_v26  ;;  %v3121_v25 = vld [vmem:[#allocation5 + $0x5e0] sm:$0xff]  }
  0x97   :  { %v3122_v26 = vld [vmem:[#allocation5 + $0x520] sm:$0xff]  }
  0x98   :  { %2708 = vmatpush3.bf16.msra.mxu0 %v3022_v30  ;;  %v95_v30 = vld [vmem:[#allocation2 + $0x70] sm:$0xff] }
  0x99   :  { %2730 = vmatpush3.bf16.msra.mxu1 %v3023_v31  ;;  %2709 = vmatprep.subr.bf16.mxu0 %v3024_v32  ;;  %v119_v31 = vpack.c.bf16 %v95_v30, %v95_v30  ;;  %v3072_v32 = vld [vmem:[#allocation5 + $0x440] sm:$0xff]   ;;  %v3126_v30 = vld [vmem:[#allocation5 + $0x528] sm:$0xff]  }
  0x9a   :  { %2731 = vmatprep.subr.bf16.mxu1 %v3025_v33  ;;  %v3073_v33 = vld [vmem:[#allocation5 + $0x4c0] sm:$0xff]  }
  0x9c   :  { %2710 = vmatpush3.bf16.msra.mxu0 %v3026_v34  ;;  %v3074_v34 = vld [vmem:[#allocation5 + $0x400] sm:$0xff]  }
  0x9d   :  { %2732 = vmatpush3.bf16.msra.mxu1 %v3027_v35  ;;  %2711 = vmatprep.subr.bf16.mxu0 %v3028_v36  ;;  %v3075_v35 = vld [vmem:[#allocation5 + $0x480] sm:$0xff]   ;;  %v3076_v36 = vld [vmem:[#allocation5 + $0x448] sm:$0xff]  }
  0x9e   :  { %2733 = vmatprep.subr.bf16.mxu1 %v3029_v37  ;;  %v3077_v37 = vld [vmem:[#allocation5 + $0x4c8] sm:$0xff]  }
  0xa0   :  { %2712 = vmatpush3.bf16.msra.mxu0 %v3030_v38  ;;  %v3078_v38 = vld [vmem:[#allocation5 + $0x408] sm:$0xff]  }
  0xa1   :  { %2734 = vmatpush3.bf16.msra.mxu1 %v3031_v39  ;;  %2713 = vmatprep.subr.bf16.mxu0 %v3032_v40  ;;  %v3079_v39 = vld [vmem:[#allocation5 + $0x488] sm:$0xff]   ;;  %v3080_v40 = vld [vmem:[#allocation5 + $0x450] sm:$0xff]  }
  0xa2   :  { %2735 = vmatprep.subr.bf16.mxu1 %v3033_v41  ;;  %v3081_v41 = vld [vmem:[#allocation5 + $0x4d0] sm:$0xff]  }
  0xa4   :  { %2714 = vmatpush3.bf16.msra.mxu0 %v3034_v42  ;;  %v3082_v42 = vld [vmem:[#allocation5 + $0x410] sm:$0xff]  }
  0xa5   :  { %2736 = vmatpush3.bf16.msra.mxu1 %v3035_v43  ;;  %2715 = vmatprep.subr.bf16.mxu0 %v3036_v44  ;;  %v3083_v43 = vld [vmem:[#allocation5 + $0x490] sm:$0xff]   ;;  %v3084_v44 = vld [vmem:[#allocation5 + $0x458] sm:$0xff]  }
  0xa6   :  { %2737 = vmatprep.subr.bf16.mxu1 %v3037_v45  ;;  %v3085_v45 = vld [vmem:[#allocation5 + $0x4d8] sm:$0xff]  }
  0xa8   :  { %2716 = vmatpush3.bf16.msra.mxu0 %v3038_v46  ;;  %v3086_v46 = vld [vmem:[#allocation5 + $0x418] sm:$0xff]  }
  0xa9   :  { %2738 = vmatpush3.bf16.msra.mxu1 %v3039_v47  ;;  %2745 = vmatprep.subr.bf16.mxu0 %v3040_v56  ;;  %v3087_v47 = vld [vmem:[#allocation5 + $0x498] sm:$0xff]   ;;  %v3096_v56 = vld [vmem:[#allocation5 + $0x470] sm:$0xff]  }
  0xaa   :  { %2767 = vmatprep.subr.bf16.mxu1 %v3041_v57  ;;  %v3097_v57 = vld [vmem:[#allocation5 + $0x4f0] sm:$0xff]  }
  0xab   :  { %1865 = vmatmul.mubr.bf16.vlgmr.msra.gmra.mrb[8].mxu0 %v113_v54  ;;  %v3094_v54 = vld [vmem:[#allocation5 + $0x428] sm:$0xff]  }
  0xac   :  { %1905 = vmatmul.mubr.bf16.vlgmr.msra.gmra.mrb[8].mxu1 %v115_v55  ;;  %2746 = vmatpush3.bf16.msra.mxu0 %v3042_v58  ;;  %v3095_v55 = vld [vmem:[#allocation5 + $0x4a8] sm:$0xff]   ;;  %v3098_v58 = vld [vmem:[#allocation5 + $0x430] sm:$0xff]  }
  0xad   :  { %2768 = vmatpush3.bf16.msra.mxu1 %v3043_v59  ;;  %2747 = vmatprep.subr.bf16.mxu0 %v3044_v60  ;;  %v3099_v59 = vld [vmem:[#allocation5 + $0x4b0] sm:$0xff]   ;;  %v3100_v60 = vld [vmem:[#allocation5 + $0x478] sm:$0xff]  }
  0xae   :  { %2769 = vmatprep.subr.bf16.mxu1 %v3045_v61  ;;  %1944 = vmatprep.mubr.bf16.mxu0 %v118_v27  ;;  %v3101_v61 = vld [vmem:[#allocation5 + $0x4f8] sm:$0xff]   ;;  %v3123_v27 = vld [vmem:[#allocation5 + $0x5a0] sm:$0xff]  }
  0xaf   :  { %1984 = vmatprep.mubr.bf16.mxu1 %v120_v28  ;;  %v3124_v28 = vld [vmem:[#allocation5 + $0x568] sm:$0xff]  }
  0xb0   :  { %2748 = vmatpush3.bf16.msra.mxu0 %v3046_v62  ;;  %v3102_v62 = vld [vmem:[#allocation5 + $0x438] sm:$0xff]  }
  0xb1   :  { %2770 = vmatpush3.bf16.msra.mxu1 %v3047_v63  ;;  %2749 = vmatprep.subr.bf16.mxu0 %v3048_v0  ;;  %v3103_v63 = vld [vmem:[#allocation5 + $0x4b8] sm:$0xff]   ;;  %v98_v0 = vld [vmem:[#allocation2 + $0x88] sm:$0xff] }
  0xb2   :  { %2771 = vmatprep.subr.bf16.mxu1 %v3049_v1  ;;  %v100_v1 = vld [vmem:[#allocation2 + $0x98] sm:$0xff] }
  0xb4   :  { %2750 = vmatpush3.bf16.msra.mxu0 %v3050_v2  ;;  %v122_v2 = vpack.c.bf16 %v98_v0, %v98_v0  ;;  %v3138_v0 = vld [vmem:[#allocation7 + $0x10] sm:$0xff]  }
  0xb5   :  { %2772 = vmatpush3.bf16.msra.mxu1 %v3051_v3  ;;  %2751 = vmatprep.subr.bf16.mxu0 %v3052_v4  ;;  %v124_v3 = vpack.c.bf16 %v100_v1, %v100_v1  ;;  %v97_v4 = vld [vmem:[#allocation2 + $0x80] sm:$0xff]  ;;  %v3139_v1 = vld [vmem:[#allocation7 + $0x18] sm:$0xff]  }
  0xb6   :  { %2773 = vmatprep.subr.bf16.mxu1 %v3053_v5  ;;  %v99_v5 = vld [vmem:[#allocation2 + $0x90] sm:$0xff] }
  0xb8   :  { %2752 = vmatpush3.bf16.msra.mxu0 %v3054_v6  ;;  %v121_v6 = vpack.c.bf16 %v97_v4, %v97_v4 }
  0xb9   :  { %2774 = vmatpush3.bf16.msra.mxu1 %v3055_v7  ;;  %2753 = vmatprep.subr.bf16.mxu0 %v3056_v8  ;;  %v123_v7 = vpack.c.bf16 %v99_v5, %v99_v5  ;;  %v3104_v8 = vld [vmem:[#allocation5 + $0x540] sm:$0xff]  }
  0xba   :  { %2775 = vmatprep.subr.bf16.mxu1 %v3057_v9  ;;  %v3105_v9 = vld [vmem:[#allocation5 + $0x5c0] sm:$0xff]  }
  0xbc   :  { %2754 = vmatpush3.bf16.msra.mxu0 %v3058_v10  ;;  %v3106_v10 = vld [vmem:[#allocation5 + $0x500] sm:$0xff]  }
  0xbd   :  { %2776 = vmatpush3.bf16.msra.mxu1 %v3059_v11  ;;  %2755 = vmatprep.subr.bf16.mxu0 %v3060_v12  ;;  %v3107_v11 = vld [vmem:[#allocation5 + $0x580] sm:$0xff]   ;;  %v3108_v12 = vld [vmem:[#allocation5 + $0x548] sm:$0xff]  }
  0xbe   :  { %2777 = vmatprep.subr.bf16.mxu1 %v3061_v13  ;;  %v3109_v13 = vld [vmem:[#allocation5 + $0x5c8] sm:$0xff]  }
  0xc0   :  { %2756 = vmatpush3.bf16.msra.mxu0 %v3062_v14  ;;  %v3110_v14 = vld [vmem:[#allocation5 + $0x508] sm:$0xff]  }
  0xc1   :  { %2778 = vmatpush3.bf16.msra.mxu1 %v3063_v15  ;;  %2757 = vmatprep.subr.bf16.mxu0 %v3064_v16  ;;  %v3111_v15 = vld [vmem:[#allocation5 + $0x588] sm:$0xff]   ;;  %v3112_v16 = vld [vmem:[#allocation5 + $0x550] sm:$0xff]  }
  0xc2   :  { %2779 = vmatprep.subr.bf16.mxu1 %v3065_v17  ;;  %v3113_v17 = vld [vmem:[#allocation5 + $0x5d0] sm:$0xff]  }
  0xc4   :  { %2758 = vmatpush3.bf16.msra.mxu0 %v3066_v18  ;;  %v3114_v18 = vld [vmem:[#allocation5 + $0x510] sm:$0xff]  }
  0xc5   :  { %2780 = vmatpush3.bf16.msra.mxu1 %v3067_v19  ;;  %2759 = vmatprep.subr.bf16.mxu0 %v3068_v20  ;;  %v3115_v19 = vld [vmem:[#allocation5 + $0x590] sm:$0xff]   ;;  %v3116_v20 = vld [vmem:[#allocation5 + $0x558] sm:$0xff]  }
  0xc6   :  { %2781 = vmatprep.subr.bf16.mxu1 %v3069_v21  ;;  %v3117_v21 = vld [vmem:[#allocation5 + $0x5d8] sm:$0xff]  }
  0xc8   :  { %2760 = vmatpush3.bf16.msra.mxu0 %v3070_v22  ;;  %v3118_v22 = vld [vmem:[#allocation5 + $0x518] sm:$0xff]  }
  0xc9   :  { %2782 = vmatpush3.bf16.msra.mxu1 %v3071_v23  ;;  %2789 = vmatprep.subr.bf16.mxu0 %v3072_v32  ;;  %v3119_v23 = vld [vmem:[#allocation5 + $0x598] sm:$0xff]   ;;  %v3128_v32 = vld [vmem:[#allocation5 + $0x570] sm:$0xff]  }
  0xca   :  { %2811 = vmatprep.subr.bf16.mxu1 %v3073_v33  ;;  %v3129_v33 = vld [vmem:[#allocation5 + $0x5f0] sm:$0xff]  }
  0xcb   :  { %1945 = vmatmul.mubr.bf16.vlgmr.msra.gmra.mrb[12].mxu0 %v117_v29  ;;  %v3125_v29 = vld [vmem:[#allocation5 + $0x5e8] sm:$0xff]  }
  0xcc   :  { %1985 = vmatmul.mubr.bf16.vlgmr.msra.gmra.mrb[12].mxu1 %v119_v31  ;;  %2790 = vmatpush3.bf16.msra.mxu0 %v3074_v34  ;;  %v3127_v31 = vld [vmem:[#allocation5 + $0x5a8] sm:$0xff]   ;;  %v3130_v34 = vld [vmem:[#allocation5 + $0x530] sm:$0xff]  }
  0xcd   :  { %2812 = vmatpush3.bf16.msra.mxu1 %v3075_v35  ;;  %2791 = vmatprep.subr.bf16.mxu0 %v3076_v36  ;;  %v3131_v35 = vld [vmem:[#allocation5 + $0x5b0] sm:$0xff]   ;;  %v3132_v36 = vld [vmem:[#allocation5 + $0x578] sm:$0xff]  }
  0xce   :  { %2813 = vmatprep.subr.bf16.mxu1 %v3077_v37  ;;  %2024 = vmatprep.mubr.bf16.mxu0 %v122_v2  ;;  %v3133_v37 = vld [vmem:[#allocation5 + $0x5f8] sm:$0xff]   ;;  %v3140_v2 = vld [vmem:[#allocation7 + $0x20] sm:$0xff]  }
  0xcf   :  { %2064 = vmatprep.mubr.bf16.mxu1 %v124_v3 }
  0xd0   :  { %2792 = vmatpush3.bf16.msra.mxu0 %v3078_v38  ;;  %v3134_v38 = vld [vmem:[#allocation5 + $0x538] sm:$0xff]  }
  0xd1   :  { %2814 = vmatpush3.bf16.msra.mxu1 %v3079_v39  ;;  %2793 = vmatprep.subr.bf16.mxu0 %v3080_v40  ;;  %v3135_v39 = vld [vmem:[#allocation5 + $0x5b8] sm:$0xff]   ;;  %v102_v40 = vld [vmem:[#allocation2 + $0xa8] sm:$0xff] }
  0xd2   :  { %2815 = vmatprep.subr.bf16.mxu1 %v3081_v41  ;;  %v126_v41 = vpack.c.bf16 %v102_v40, %v102_v40 }
  0xd4   :  { %2794 = vmatpush3.bf16.msra.mxu0 %v3082_v42  ;;  %v104_v42 = vld [vmem:[#allocation2 + $0xb8] sm:$0xff] }
  0xd5   :  { %2816 = vmatpush3.bf16.msra.mxu1 %v3083_v43  ;;  %2795 = vmatprep.subr.bf16.mxu0 %v3084_v44  ;;  %v101_v43 = vld [vmem:[#allocation2 + $0xa0] sm:$0xff]  ;;  %v103_v44 = vld [vmem:[#allocation2 + $0xb0] sm:$0xff] }
  0xd6   :  { %2817 = vmatprep.subr.bf16.mxu1 %v3085_v45  ;;  %v128_v45 = vpack.c.bf16 %v104_v42, %v104_v42 }
  0xd8   :  { %2796 = vmatpush3.bf16.msra.mxu0 %v3086_v46  ;;  %v125_v46 = vpack.c.bf16 %v101_v43, %v101_v43 }
  0xd9   :  { %2818 = vmatpush3.bf16.msra.mxu1 %v3087_v47  ;;  %2797 = vmatprep.subr.bf16.mxu0 %v3088_v48  ;;  %v127_v47 = vpack.c.bf16 %v103_v44, %v103_v44 }
  0xda   :  { %2819 = vmatprep.subr.bf16.mxu1 %v3089_v49 }
  0xdc   :  { %2798 = vmatpush3.bf16.msra.mxu0 %v3090_v50  ;;  %v2402_v50 = vld [vmem:[%s3421_s2] ss:$0 sm:$0xff] }
  0xdd   :  { %2820 = vmatpush3.bf16.msra.mxu1 %v3091_v51  ;;  %2799 = vmatprep.subr.bf16.mxu0 %v3092_v52 }
  0xde   :  { %2821 = vmatprep.subr.bf16.mxu1 %v3093_v53 }
  0xe0   :  { %2800 = vmatpush3.bf16.msra.mxu0 %v3094_v54 }
  0xe1   :  { %2822 = vmatpush3.bf16.msra.mxu1 %v3095_v55  ;;  %2801 = vmatprep.subr.bf16.mxu0 %v3096_v56 }
  0xe2   :  { %2823 = vmatprep.subr.bf16.mxu1 %v3097_v57 }
  0xe4   :  { %2802 = vmatpush3.bf16.msra.mxu0 %v3098_v58 }
  0xe5   :  { %2824 = vmatpush3.bf16.msra.mxu1 %v3099_v59  ;;  %2803 = vmatprep.subr.bf16.mxu0 %v3100_v60 }
  0xe6   :  { %2825 = vmatprep.subr.bf16.mxu1 %v3101_v61  ;;  %v3136_v61 = vld [vmem:[#allocation7] sm:$0xff]  }
  0xe8   :  { %2804 = vmatpush3.bf16.msra.mxu0 %v3102_v62  ;;  %v3280_v62 = vmov 0.0  }
  0xe9   :  { %2826 = vmatpush3.bf16.msra.mxu1 %v3103_v63  ;;  %2833 = vmatprep.subr.bf16.mxu0 %v3104_v8  ;;  %v3137_v63 = vld [vmem:[#allocation7 + $0x8] sm:$0xff]  }
  0xea   :  { %2855 = vmatprep.subr.bf16.mxu1 %v3105_v9 }
  0xeb   :  { %2025 = vmatmul.mubr.bf16.vlgmr.msra.gmra.mrb[16].mxu0 %v121_v6 }
  0xec   :  { %2065 = vmatmul.mubr.bf16.vlgmr.msra.gmra.mrb[16].mxu1 %v123_v7  ;;  %2834 = vmatpush3.bf16.msra.mxu0 %v3106_v10 }
  0xed   :  { %2856 = vmatpush3.bf16.msra.mxu1 %v3107_v11  ;;  %2835 = vmatprep.subr.bf16.mxu0 %v3108_v12 }
  0xee   :  { %2857 = vmatprep.subr.bf16.mxu1 %v3109_v13  ;;  %2104 = vmatprep.mubr.bf16.mxu0 %v126_v41 }
  0xef   :  { %2144 = vmatprep.mubr.bf16.mxu1 %v128_v45 }
  0xf0   :  { %2836 = vmatpush3.bf16.msra.mxu0 %v3110_v14  ;;  %v3141_v14 = vld [vmem:[#allocation7 + $0x28] sm:$0xff]  }
  0xf1   :  { %2858 = vmatpush3.bf16.msra.mxu1 %v3111_v15  ;;  %2837 = vmatprep.subr.bf16.mxu0 %v3112_v16  ;;  %v3142_v16 = vld [vmem:[#allocation7 + $0x30] sm:$0xff]  }
  0xf2   :  { %2859 = vmatprep.subr.bf16.mxu1 %v3113_v17  ;;  %v3143_v17 = vld [vmem:[#allocation7 + $0x38] sm:$0xff]  }
  0xf4   :  { %2838 = vmatpush3.bf16.msra.mxu0 %v3114_v18  ;;  %v3144_v18 = vld [vmem:[#allocation8] sm:$0xff]  }
  0xf5   :  { %2860 = vmatpush3.bf16.msra.mxu1 %v3115_v19  ;;  %2839 = vmatprep.subr.bf16.mxu0 %v3116_v20  ;;  %v3145_v19 = vld [vmem:[#allocation8 + $0x8] sm:$0xff]   ;;  %v3146_v20 = vld [vmem:[#allocation8 + $0x10] sm:$0xff]  }
  0xf6   :  { %2861 = vmatprep.subr.bf16.mxu1 %v3117_v21  ;;  %v3147_v21 = vld [vmem:[#allocation8 + $0x18] sm:$0xff]  }
  0xf8   :  { %2840 = vmatpush3.bf16.msra.mxu0 %v3118_v22  ;;  %v3148_v22 = vld [vmem:[#allocation8 + $0x20] sm:$0xff]  }
  0xf9   :  { %2862 = vmatpush3.bf16.msra.mxu1 %v3119_v23  ;;  %2841 = vmatprep.subr.bf16.mxu0 %v3120_v24 }
  0xfa   :  { %2863 = vmatprep.subr.bf16.mxu1 %v3121_v25 }
  0xfc   :  { %2842 = vmatpush3.bf16.msra.mxu0 %v3122_v26 }
  0xfd   :  { %2864 = vmatpush3.bf16.msra.mxu1 %v3123_v27  ;;  %2843 = vmatprep.subr.bf16.mxu0 %v3124_v28 }
  0xfe   :  { %2865 = vmatprep.subr.bf16.mxu1 %v3125_v29  ;;  %v3149_v29 = vld [vmem:[#allocation8 + $0x28] sm:$0xff]  }
 0x100   :  { %2844 = vmatpush3.bf16.msra.mxu0 %v3126_v30 }
 0x101   :  { %2866 = vmatpush3.bf16.msra.mxu1 %v3127_v31  ;;  %2845 = vmatprep.subr.bf16.mxu0 %v3128_v32 }
 0x102   :  { %2867 = vmatprep.subr.bf16.mxu1 %v3129_v33 }
 0x104   :  { %2846 = vmatpush3.bf16.msra.mxu0 %v3130_v34 }
 0x105   :  { %2868 = vmatpush3.bf16.msra.mxu1 %v3131_v35  ;;  %2847 = vmatprep.subr.bf16.mxu0 %v3132_v36 }
 0x106   :  { %2869 = vmatprep.subr.bf16.mxu1 %v3133_v37 }
 0x108   :  { %2848 = vmatpush3.bf16.msra.mxu0 %v3134_v38 }
 0x109   :  { %2870 = vmatpush3.bf16.msra.mxu1 %v3135_v39  ;;  %2895 = vmatprep.subr.bf16.mxu0 %v3280_v62 }
 0x10a   :  { %2915 = vmatprep.subr.bf16.mxu1 %v3280_v62 }
 0x10b   :  { %2105 = vmatmul.mubr.bf16.vlgmr.msra.gmra.mrb[20].mxu0 %v125_v46 }
 0x10c   :  { %2145 = vmatmul.mubr.bf16.vlgmr.msra.gmra.mrb[20].mxu1 %v127_v47  ;;  %2896 = vmatpush3.bf16.msra.mxu0 %v3136_v61 }
 0x10d   :  { %2897 = vmatprep.subr.bf16.mxu0 %v3280_v62  ;;  %2911 = vmatprep.mubr.msk.bf16.mxu0 %vm3281_vm0, %v3280_v62 }
 0x10e   :  { %2931 = vmatprep.mubr.msk.bf16.mxu1 %vm3281_vm0, %v3280_v62  ;;  %2916 = vmatpush3.bf16.msra.mxu1 %v3144_v18 }
 0x10f   :  { %2917 = vmatprep.subr.bf16.mxu1 %v3280_v62 }
 0x110   :  { %2898 = vmatpush3.bf16.msra.mxu0 %v3137_v63 }
 0x111   :  { %2899 = vmatprep.subr.bf16.mxu0 %v3280_v62 }
 0x112   :  { %2918 = vmatpush3.bf16.msra.mxu1 %v3145_v19 }
 0x113   :  { %2919 = vmatprep.subr.bf16.mxu1 %v3280_v62 }
 0x114   :  { %2900 = vmatpush3.bf16.msra.mxu0 %v3138_v0 }
 0x115   :  { %2901 = vmatprep.subr.bf16.mxu0 %v3280_v62 }
 0x116   :  { %2920 = vmatpush3.bf16.msra.mxu1 %v3146_v20 }
 0x117   :  { %2921 = vmatprep.subr.bf16.mxu1 %v3280_v62 }
 0x118   :  { %2902 = vmatpush3.bf16.msra.mxu0 %v3139_v1 }
 0x119   :  { %2903 = vmatprep.subr.bf16.mxu0 %v3280_v62 }
 0x11a   :  { %2922 = vmatpush3.bf16.msra.mxu1 %v3147_v21  ;;  %v2604_v21 = vld [vmem:[%s3425_s6] ss:$0 sm:$0xff] }
 0x11b   :  { %2923 = vmatprep.subr.bf16.mxu1 %v3280_v62 }
 0x11c   :  { %2904 = vmatpush3.bf16.msra.mxu0 %v3140_v2 }
 0x11d   :  { %2905 = vmatprep.subr.bf16.mxu0 %v3280_v62 }
 0x11e   :  { %2924 = vmatpush3.bf16.msra.mxu1 %v3148_v22 }
 0x11f   :  { %2925 = vmatprep.subr.bf16.mxu1 %v3280_v62 }
 0x120   :  { %2906 = vmatpush3.bf16.msra.mxu0 %v3141_v14 }
 0x121   :  { %2907 = vmatprep.subr.bf16.mxu0 %v3280_v62 }
 0x122   :  { %2926 = vmatpush3.bf16.msra.mxu1 %v3149_v29 }
 0x123   :  { %2927 = vmatprep.subr.bf16.mxu1 %v3280_v62 }
 0x124   :  { %2908 = vmatpush3.bf16.msra.mxu0 %v3142_v16 }
 0x125   :  { %2909 = vmatprep.subr.bf16.mxu0 %v3280_v62 }
 0x128   :  { %2910 = vmatpush3.bf16.msra.mxu0 %v3143_v17 }
 0x13e   :  { %v2629_v48 = vpop.f32.mrb[0].mxu0 }
 0x13f   :  { %v2651_v49 = vpop.f32.mrb[0].mxu1  ;;  %v2630_v51 = vpop.f32.mrb[1].mxu0 }
 0x140   :  { %v2652_v52 = vpop.f32.mrb[1].mxu1  ;;  %v2631_v53 = vadd.f32 %v2630_v51, %v2629_v48  ;;  %v2632_v55 = vpop.f32.mrb[2].mxu0 }
 0x141   :  { %v2653_v54 = vadd.f32 %v2652_v52, %v2651_v49  ;;  %v2654_v56 = vpop.f32.mrb[2].mxu1  ;;  %v2633_v57 = vpop.f32.mrb[3].mxu0 }
 0x142   :  { %v2655_v58 = vpop.f32.mrb[3].mxu1  ;;  %v1707_v59 = vadd.f32 %v2631_v53, %v2402_v50 }
 0x144   :  { %v1747_v60 = vadd.f32 %v2653_v54, %v1707_v59 }
 0x15e   :  { %v2673_v3 = vpop.f32.mrb[4].mxu0 }
 0x15f   :  { %v2695_v4 = vpop.f32.mrb[4].mxu1  ;;  %v2674_v5 = vpop.f32.mrb[5].mxu0 }
 0x160   :  { %v2675_v6 = vadd.f32 %v2674_v5, %v2673_v3  ;;  %v2696_v7 = vpop.f32.mrb[5].mxu1  ;;  %v2676_v8 = vpop.f32.mrb[6].mxu0 }
 0x161   :  { %v2697_v9 = vadd.f32 %v2696_v7, %v2695_v4  ;;  %v2698_v10 = vpop.f32.mrb[6].mxu1  ;;  %v2677_v11 = vpop.f32.mrb[7].mxu0 }
 0x162   :  { %v1787_v12 = vadd.f32 %v2675_v6, %v1747_v60  ;;  %v2699_v13 = vpop.f32.mrb[7].mxu1  ;;  %v3150_v11 = vld [vmem:[#allocation8 + $0x30] sm:$0xff]  }
 0x163   :  { %2928 = vmatpush3.bf16.msra.mxu1 %v3150_v11  ;;  %v2595_v13 = vld [vmem:[%s3423_s4] ss:$0 sm:$0xff]  ;;  %s3282_s4 = smov [#allocation10]  }
 0x164   :  { %v1827_v15 = vadd.f32 %v2697_v9, %v1787_v12  ;;  %2929 = vmatprep.subr.bf16.mxu1 %v3280_v62  ;;  %v3151_v12 = vld [vmem:[#allocation8 + $0x38] sm:$0xff]   ;;  %s2391_s28 = sshll.u32 %s3282_s4, 4  ;;  %s2392_s28 = int_to_ptr.vmem [resolvable:$true] %s2391_s28 }
 0x165   :  { %s3244_s29 = scalar_lea.vmem %s2392_s28, 64  ;;  %p3249_p5 = scmp.lt.s32.totalorder %s2392_s28, %s2392_s28 }
 0x166   :  { %p3245_p4 = scmp.ne.s32.totalorder %s2392_s28, %s3244_s29  ;;  %p3250_p6 = scmp.lt.s32.totalorder %s3244_s29, %s3244_s29 }
 0x167   :  { %2930 = vmatpush3.bf16.msra.mxu1 %v3151_v12 }
 0x168   :  { %p3251_p7 = por %p3250_p6, %p3249_p5 }
 0x16a   :  { %p3252_p8 = pnand %p3251_p7, %p3245_p4 }
 0x17e   :  { %v2717_v23 = vpop.f32.mrb[8].mxu0 }
 0x17f   :  { %v2739_v24 = vpop.f32.mrb[8].mxu1  ;;  %v2718_v25 = vpop.f32.mrb[9].mxu0 }
 0x180   :  { %v2719_v26 = vadd.f32 %v2718_v25, %v2717_v23  ;;  %v2740_v27 = vpop.f32.mrb[9].mxu1  ;;  %v2720_v28 = vpop.f32.mrb[10].mxu0 }
 0x181   :  { %v2741_v30 = vadd.f32 %v2740_v27, %v2739_v24  ;;  %v2742_v31 = vpop.f32.mrb[10].mxu1  ;;  %v2721_v32 = vpop.f32.mrb[11].mxu0 }
 0x182   :  { %v1867_v33 = vadd.f32 %v2719_v26, %v1827_v15  ;;  %v2743_v34 = vpop.f32.mrb[11].mxu1 }
 0x184   :  { %v1907_v35 = vadd.f32 %v2741_v30, %v1867_v33 }
 0x19e   :  { %v2761_v36 = vpop.f32.mrb[12].mxu0 }
 0x19f   :  { %v2783_v37 = vpop.f32.mrb[12].mxu1  ;;  %v2762_v38 = vpop.f32.mrb[13].mxu0 }
 0x1a0   :  { %v2784_v39 = vpop.f32.mrb[13].mxu1  ;;  %v2763_v40 = vadd.f32 %v2762_v38, %v2761_v36  ;;  %v2764_v42 = vpop.f32.mrb[14].mxu0 }
 0x1a1   :  { %v2785_v41 = vadd.f32 %v2784_v39, %v2783_v37  ;;  %v2786_v43 = vpop.f32.mrb[14].mxu1  ;;  %v2765_v44 = vpop.f32.mrb[15].mxu0 }
 0x1a2   :  { %v2787_v45 = vpop.f32.mrb[15].mxu1  ;;  %v1947_v46 = vadd.f32 %v2763_v40, %v1907_v35 }
 0x1a4   :  { %v1987_v47 = vadd.f32 %v2785_v41, %v1947_v46 }
 0x1be   :  { %v2805_v48 = vpop.f32.mrb[16].mxu0 }
 0x1bf   :  { %v2827_v49 = vpop.f32.mrb[16].mxu1  ;;  %v2806_v50 = vpop.f32.mrb[17].mxu0 }
 0x1c0   :  { %v2807_v51 = vadd.f32 %v2806_v50, %v2805_v48  ;;  %v2828_v52 = vpop.f32.mrb[17].mxu1  ;;  %v2808_v53 = vpop.f32.mrb[18].mxu0 }
 0x1c1   :  { %v2829_v54 = vadd.f32 %v2828_v52, %v2827_v49  ;;  %v2830_v55 = vpop.f32.mrb[18].mxu1  ;;  %v2809_v56 = vpop.f32.mrb[19].mxu0 }
 0x1c2   :  { %v2027_v57 = vadd.f32 %v2807_v51, %v1987_v47  ;;  %v2831_v58 = vpop.f32.mrb[19].mxu1 }
 0x1c4   :  { %v2067_v59 = vadd.f32 %v2829_v54, %v2027_v57 }
 0x1de   :  { %v2849_v60 = vpop.f32.mrb[20].mxu0 }
 0x1df   :  { %v2871_v61 = vpop.f32.mrb[20].mxu1  ;;  %v2850_v63 = vpop.f32.mrb[21].mxu0 }
 0x1e0   :  { %v2851_v0 = vadd.f32 %v2850_v63, %v2849_v60  ;;  %v2872_v1 = vpop.f32.mrb[21].mxu1  ;;  %v2852_v2 = vpop.f32.mrb[22].mxu0 }
 0x1e1   :  { %v2873_v3 = vadd.f32 %v2872_v1, %v2871_v61  ;;  %v2874_v4 = vpop.f32.mrb[22].mxu1  ;;  %v2853_v5 = vpop.f32.mrb[23].mxu0 }
 0x1e2   :  { %v2107_v6 = vadd.f32 %v2851_v0, %v2067_v59  ;;  %v2875_v7 = vpop.f32.mrb[23].mxu1 }
 0x1e4   :  { %v2147_v8 = vadd.f32 %v2873_v3, %v2107_v6 }
 0x1e6   :  { %v2152_v9 = vmax.f32 %v2147_v8, 0.0 }
 0x1e8   :  { %v2153_v10 = vpack.c.bf16 %v2152_v9, %v2152_v9 }
 0x1ea   :  { %2912 = vmatmul.mubr.bf16.vlgmr.msra.gmra.mrb[24].mxu0 %v2153_v10 }
 0x2bd   :  { %v2259_v14 = vpop.f32.mrb[24].mxu0 }
 0x2be   :  { %v2260_v15 = vadd.f32 %v2595_v13, %v2259_v14  ;;  %v2913_v16 = vpop.f32.mrb[25].mxu0 }
 0x2bf   :  { %v2262_v17 = vpop.f32.mrb[26].mxu0 }
 0x2c0   :  { %v2265_v18 = vmax.f32 %v2260_v15, 0.0  ;;  %v2914_v19 = vpop.f32.mrb[27].mxu0 }
 0x2c2   :  { %v2266_v20 = vpack.c.bf16 %v2265_v18, %v2265_v18 }
 0x2c4   :  { %2932 = vmatmul.mubr.bf16.vlgmr.msra.gmra.mrb[24].mxu1 %v2266_v20 }
 0x397   :  { %v2372_v22 = vpop.f32.mrb[24].mxu1 }
 0x398   :  { %v2373_v62 = vadd.f32 %v2604_v21, %v2372_v22  ;;  %v2933_v23 = vpop.f32.mrb[25].mxu1 }
 0x399   :  { %v2375_v24 = vpop.f32.mrb[26].mxu1 }
 0x39a   :  { %v2378_v25 = vsub.f32 0.0, %v2373_v62  ;;  %v2934_v26 = vpop.f32.mrb[27].mxu1 }
 0x39c   :  { %v2379_v27 = vmul.f32 1.442695, %v2378_v25 }
 0x39e   :  { %3152 = vpow2.f32 %v2379_v27 }
 0x3a8   :  { %v3153_v28 = vpop.eup %3152 }
 0x3a9   :  { %v2381_v29 = vadd.f32 1.0, %v3153_v28 }
 0x3ab   :  { %3154 = vrcp.f32 %v2381_v29 }
 0x3b5   :  { %v3155_v30 = vpop.eup %3154 }
 0x3b6   :  { %v2383_v31 = vpack.c.bf16 %v3155_v30, %v3155_v30 }
 0x3b8   :  { %2384 = vst [vmem:[#allocation10] sm:$0xf] %v2383_v31 }
 0x3b9   :  { %3255 = shalt.err (!%p3252_p8)
}
 0x3ba   :  { %s3256_s8 = scalar_lea.hbm %s3426_s7, 64 }
 0x3bb   :  { %p3257_p9 = scmp.ne.s32.totalorder %s3426_s7, %s3256_s8  ;;  %p3260_p10 = scmp.lt.u32.totalorder %s3256_s8, %s3426_s7 }
 0x3bd   :  { %p3262_p11 = pnand %p3260_p10, %p3257_p9 }
 0x3bf   :  { %3265 = shalt.err (!%p3262_p11)
}
 0x3c0   :  { %2394 = dma.vmem_to_hbm [thread:$0]  %s2392_s28, 64, %s3426_s7, [#allocation4]  }
 0x3c1   :  { %3272 = dma.done.wait [#allocation4], 64  }
 0x3c2   :  { %3273 = vsyncadd [#allocation4], 4294967232 }
 0x3c3   :  { %2398 = vsyncpa [#allocation3], 1 }
 0x3c4   :  { %2399 = vsyncpa [#allocation6], 1 }
 0x3c5   :  { %2400 = vsyncpa [#allocation9], 1 }
 0x3c6   :  { %2401 = vsyncpa [#allocation4], 1 }

</bundles_post_ra>
